<compile_context>
chip_gen: v7x
topology: tpu7x:2x2x1
jax: 0.10.0
libtpu: 0.0.40
codegen_flags: <defaults>
</compile_context>

<pallas_src>
import math

import jax
import jax.numpy as jnp
from jax import lax
from jax.experimental import pallas as pl
from jax.experimental.pallas import tpu as pltpu


def _round_up(n, m):
    return ((n + m - 1) // m) * m


# ---------------------------------------------------------------------------
# Kernels
# ---------------------------------------------------------------------------

def _mm_kernel_inplace(x_ref, wt_ref, b_ref, o_ref):
    """f32-output variant: accumulate directly into the K-resident output block.

    x_ref : (mb, tb, tk)            activations (compute dtype)
    wt_ref: (mb, tk, tn)            pre-transposed weight (models, d_in, d_out)
    b_ref : (mb, 1,  tn)  float32   bias
    o_ref : (mb, tb, tn)  float32   output block, resident across the K axis
    """
    k = pl.program_id(3)
    prod = lax.dot_general(
        x_ref[...],
        wt_ref[...],
        dimension_numbers=(((2,), (1,)), ((0,), (0,))),
        preferred_element_type=jnp.float32,
    )

    @pl.when(k == 0)
    def _first():
        # Direct store (no zero-init pass); bias folded in here.
        o_ref[...] = prod + b_ref[...]

    @pl.when(k > 0)
    def _rest():
        o_ref[...] = o_ref[...] + prod


def _mm_kernel_scratch(x_ref, wt_ref, b_ref, o_ref, acc_ref):
    """Generic variant (non-f32 output): f32 scratch accumulator, cast on finalize."""
    k = pl.program_id(3)
    prod = lax.dot_general(
        x_ref[...],
        wt_ref[...],
        dimension_numbers=(((2,), (1,)), ((0,), (0,))),
        preferred_element_type=jnp.float32,
    )

    @pl.when(k == 0)
    def _first():
        acc_ref[...] = prod + b_ref[...]

    @pl.when(k > 0)
    def _rest():
        acc_ref[...] = acc_ref[...] + prod

    @pl.when(k == pl.num_programs(3) - 1)
    def _finalize():
        o_ref[...] = acc_ref[...].astype(o_ref.dtype)


# ---------------------------------------------------------------------------
# Hardware query (defensive) and tile selection
# ---------------------------------------------------------------------------

def _hw_info():
    """Return (vmem_limit_bytes, is_v5) with conservative fallbacks."""
    vmem_phys = None
    try:
        info = pltpu.get_tpu_info()
        vmem_phys = getattr(info, "vmem_capacity_bytes", None)
    except Exception:
        vmem_phys = None
    if not vmem_phys:
        vmem_phys = 64 * 1024 * 1024  # conservative: v7x per-TensorCore VMEM

    kind = ""
    try:
        kind = jax.devices()[0].device_kind.lower()
    except Exception:
        pass
    is_v5 = "v5" in kind
    is_v7 = ("v7" in kind) or ("7x" in kind)

    # Leave headroom for compiler-internal scratch; never exceed 96 MiB, and
    # never assume more than 48 MiB on v7x (64 MiB physical per TC).
    vmem_limit = min(int(vmem_phys * 3 // 4), 96 * 1024 * 1024)
    if is_v7:
        vmem_limit = min(vmem_limit, 48 * 1024 * 1024)
    return vmem_limit, is_v5


def _select_tiles(n_models, batch, d_out_p, d_in_p, k_splittable,
                  in_isz, out_isz, need_scratch, vmem_budget, is_v5):
    """Pick (mb, tb, tn, tk); shrink until the double-buffered set fits VMEM."""
    # Output-feature tile: lane-dense multiple of 128, up to 512.
    tn = 128
    for cand in (512, 256, 128):
        if d_out_p % cand == 0:
            tn = cand
            break

    # Batch tile: match the MXU (256-row on v6e/v7x, 128 on v5e).
    tb_cap = 128 if is_v5 else 256
    tb = batch if batch <= tb_cap else tb_cap

    # Contraction tile: single tile when K fits, else 512-wide tiles.
    tk = 512 if k_splittable else d_in_p

    # Models per grid step.
    mb = min(n_models, 8)

    # Guarantee a parallel axis with extent >= 2 (v7x has 2 TensorCores).
    if (n_models >= 2
            and pl.cdiv(batch, tb) == 1
            and d_out_p // tn == 1
            and pl.cdiv(n_models, mb) == 1):
        mb = max(1, (n_models + 1) // 2)

    def footprint(mb_, tb_, tn_, tk_):
        x_b = mb_ * tb_ * tk_ * in_isz
        w_b = mb_ * tk_ * tn_ * in_isz
        b_b = mb_ * tn_ * 4
        o_b = mb_ * tb_ * tn_ * out_isz
        acc = mb_ * tb_ * tn_ * 4 if need_scratch else 0
        # Inputs and outputs are double-buffered by the auto-pipeline.
        return 2 * (x_b + w_b + b_b + o_b) + acc

    budget = int(vmem_budget * 0.85)
    while footprint(mb, tb, tn, tk) > budget:
        if mb > 1:
            mb = (mb + 1) // 2
        elif k_splittable and tk > 256:
            tk = 256
        elif tn > 128:
            tn //= 2
        elif tb == 256:
            tb = 128
        else:
            break
    return mb, tb, tn, tk


# ---------------------------------------------------------------------------
# Public API
# ---------------------------------------------------------------------------

def make_multilinear(weight, bias, *, compute_dtype=None, out_dtype=None):
    """Prepare a MultiLinear forward closure.

    out[m, b, o] = sum_i weight[m, o, i] * x[m, b, i] + bias[m, o]

    All weight-side prep (padding, transpose to (m, d_in, d_out), optional
    bf16 cast) happens once here, outside the per-call hot path.
    """
    n_models, d_out, d_in = weight.shape
    assert bias.shape == (n_models, d_out)

    compute_dtype = jnp.dtype(compute_dtype if compute_dtype is not None
                              else weight.dtype)
    out_dtype = jnp.dtype(out_dtype if out_dtype is not None else weight.dtype)

    vmem_limit, is_v5 = _hw_info()

    # Pad d_out so output stores are lane-dense (unmasked vst).
    d_out_p = _round_up(max(d_out, 1), 128)
    # Split K only when it is large; otherwise one exact K tile (enables
    # weight-block reuse across batch tiles).
    k_splittable = d_in > 1024
    d_in_p = _round_up(d_in, 512) if k_splittable else d_in

    # ---- one-time weight / bias prep (hoisted out of the forward path) ----
    w = weight
    b = bias
    if d_out_p != d_out:
        w = jnp.pad(w, ((0, 0), (0, d_out_p - d_out), (0, 0)))
        b = jnp.pad(b, ((0, 0), (0, d_out_p - d_out)))
    if d_in_p != d_in:
        w = jnp.pad(w, ((0, 0), (0, 0), (0, d_in_p - d_in)))
    # Pre-transpose once to (m, d_in, d_out): standard [K, N] MXU feed,
    # no in-kernel relayout.
    wt_p = jnp.transpose(w, (0, 2, 1)).astype(compute_dtype)
    b_p = b.reshape(n_models, 1, d_out_p).astype(jnp.float32)

    need_scratch = out_dtype != jnp.float32
    kernel = _mm_kernel_scratch if need_scratch else _mm_kernel_inplace

    in_isz = compute_dtype.itemsize
    out_isz = out_dtype.itemsize

    def forward(x):
        nm2, batch, d_in2 = x.shape
        assert nm2 == n_models and d_in2 == d_in

        mb, tb, tn, tk = _select_tiles(
            n_models, batch, d_out_p, d_in_p, k_splittable,
            in_isz, out_isz, need_scratch, vmem_limit, is_v5)

        xx = x.astype(compute_dtype)
        if d_in_p != d_in:
            xx = jnp.pad(xx, ((0, 0), (0, 0), (0, d_in_p - d_in)))

        grid = (
            pl.cdiv(n_models, mb),   # model blocks          (parallel)
            d_out_p // tn,           # output-feature tiles   (parallel)
            pl.cdiv(batch, tb),      # batch tiles            (parallel, fastest
                                     #   non-K axis -> weight block reuse)
            d_in_p // tk,            # contraction tiles      (arbitrary, innermost)
        )

        scratch = [pltpu.VMEM((mb, tb, tn), jnp.float32)] if need_scratch else []

        out = pl.pallas_call(
            kernel,
            out_shape=jax.ShapeDtypeStruct((n_models, batch, d_out_p), out_dtype),
            grid_spec=pltpu.PrefetchScalarGridSpec(
                num_scalar_prefetch=0,
                grid=grid,
                in_specs=[
                    # x[m_blk, b_blk, k_blk]
                    pl.BlockSpec((mb, tb, tk), lambda m, n, bt, k: (m, bt, k)),
                    # weight_t[m_blk, k_blk, n_blk]  (ignores bt -> reused DMA)
                    pl.BlockSpec((mb, tk, tn), lambda m, n, bt, k: (m, k, n)),
                    # bias[m_blk, 0, n_blk]
                    pl.BlockSpec((mb, 1, tn), lambda m, n, bt, k: (m, 0, n)),
                ],
                out_specs=pl.BlockSpec((mb, tb, tn), lambda m, n, bt, k: (m, bt, n)),
                scratch_shapes=scratch,
            ),
            compiler_params=pltpu.CompilerParams(
                dimension_semantics=("parallel", "parallel", "parallel", "arbitrary"),
                vmem_limit_bytes=int(vmem_limit),
            ),
        )(xx, wt_p, b_p)

        if d_out_p != d_out:
            out = out[..., :d_out]
        return out

    return jax.jit(forward)


def multilinear_forward(weight, bias, x, **kwargs):
    """One-shot convenience wrapper (prefer make_multilinear for repeated calls)."""
    return make_multilinear(weight, bias, **kwargs)(x)


# ---------------------------------------------------------------------------
# Self-test
# ---------------------------------------------------------------------------

if __name__ == "__main__":
    n_models, batch, d_in, d_out = 4, 8, 32, 16

    key = jax.random.PRNGKey(0)
    k_w, k_b, k_x = jax.random.split(key, 3)

    # Init mirroring nn.init.normal_(w, 0, 1/sqrt(d_in)); small nonzero bias
    # so the bias-add path is exercised.
    weight = (jax.random.normal(k_w, (n_models, d_out, d_in), dtype=jnp.float32)
              * (1.0 / math.sqrt(d_in)))
    bias = 0.1 * jax.random.normal(k_b, (n_models, d_out), dtype=jnp.float32)
    x = jax.random.normal(k_x, (n_models, batch, d_in), dtype=jnp.float32)

    ref = jnp.einsum("moi,mbi->mbo", weight, x) + bias[:, None, :]

    # f32 path: tight tolerance against the reference.
    fwd = make_multilinear(weight, bias)
    out = jax.block_until_ready(fwd(x))
    assert out.shape == (n_models, batch, d_out)
    assert jnp.allclose(out, ref, atol=1e-5, rtol=1e-5), "f32 mismatch vs reference"

    # bf16-operand path (f32 accumulation): deliberately looser tolerance.
    fwd_bf16 = make_multilinear(weight, bias, compute_dtype=jnp.bfloat16)
    out_bf16 = jax.block_until_ready(fwd_bf16(x))
    assert out_bf16.shape == (n_models, batch, d_out)
    assert jnp.allclose(out_bf16, ref, atol=3e-2, rtol=3e-2), "bf16 mismatch vs reference"

    print("KERNEL_OK")
</pallas_src>

<mosaic_0001>
module attributes {stable_mosaic.version = 11 : i64} {
  func.func @_mm_kernel_inplace(%arg0: i32, %arg1: i32, %arg2: i32, %arg3: i32, %arg4: memref<2x8x32xf32, #tpu.memory_space<vmem>>, %arg5: memref<2x32x128xf32, #tpu.memory_space<vmem>>, %arg6: memref<2x1x128xf32, #tpu.memory_space<vmem>>, %arg7: memref<2x8x128xf32, #tpu.memory_space<vmem>>) attributes {dimension_semantics = [#tpu.dimension_semantics<parallel>, #tpu.dimension_semantics<parallel>, #tpu.dimension_semantics<parallel>, #tpu.dimension_semantics<arbitrary>], iteration_bounds = array<i64: 2, 1, 1, 1>, scalar_prefetch = 0 : i64, scratch_operands = 0 : i64, tpu.core_type = #tpu.core_type<tc>, window_params = [{transform_indices = @transform_0, window_bounds = array<i64: 2, 8, 32>}, {transform_indices = @transform_1, window_bounds = array<i64: 2, 32, 128>}, {transform_indices = @transform_2, window_bounds = array<i64: 2, 1, 128>}, {transform_indices = @transform_3, window_bounds = array<i64: 2, 8, 128>}]} {
    %c0 = arith.constant 0 : index
    %c0_0 = arith.constant 0 : index
    %c0_1 = arith.constant 0 : index
    %0 = vector.load %arg4[%c0, %c0_0, %c0_1] : memref<2x8x32xf32, #tpu.memory_space<vmem>>, vector<2x8x32xf32>
    %c0_2 = arith.constant 0 : index
    %c0_3 = arith.constant 0 : index
    %c0_4 = arith.constant 0 : index
    %1 = vector.load %arg5[%c0_2, %c0_3, %c0_4] : memref<2x32x128xf32, #tpu.memory_space<vmem>>, vector<2x32x128xf32>
    %cst = arith.constant dense<0.000000e+00> : vector<2x8x128xf32>
    %2 = tpu.matmul %0, %1, %cst {dimension_numbers = #tpu.dot_dimension_numbers<[2], [1], [1], [2], [0, 0, 0, 1, 1, 2], [0], [0]>} : vector<2x8x32xf32>, vector<2x32x128xf32>, vector<2x8x128xf32> -> vector<2x8x128xf32>
    %c0_i32 = arith.constant 0 : i32
    %3 = arith.cmpi eq, %arg3, %c0_i32 : i32
    %4 = arith.extui %3 : i1 to i32
    %c0_i32_5 = arith.constant 0 : i32
    %5 = arith.cmpi ne, %4, %c0_i32_5 : i32
    scf.if %5 {
      %c0_8 = arith.constant 0 : index
      %c0_9 = arith.constant 0 : index
      %c0_10 = arith.constant 0 : index
      %9 = vector.load %arg6[%c0_8, %c0_9, %c0_10] : memref<2x1x128xf32, #tpu.memory_space<vmem>>, vector<2x1x128xf32>
      %10 = vector.broadcast %9 : vector<2x1x128xf32> to vector<2x8x128xf32>
      %11 = arith.addf %2, %10 : vector<2x8x128xf32>
      %c0_11 = arith.constant 0 : index
      %c0_12 = arith.constant 0 : index
      %c0_13 = arith.constant 0 : index
      %12 = vector.load %arg7[%c0_11, %c0_12, %c0_13] : memref<2x8x128xf32, #tpu.memory_space<vmem>>, vector<2x8x128xf32>
      tpu.vector_store %arg7[%c0_11, %c0_12, %c0_13], %11 {strides = array<i32>} : memref<2x8x128xf32, #tpu.memory_space<vmem>>, vector<2x8x128xf32>,
    } else {
    }
    %c0_i32_6 = arith.constant 0 : i32
    %6 = arith.cmpi sgt, %arg3, %c0_i32_6 : i32
    %7 = arith.extui %6 : i1 to i32
    %c0_i32_7 = arith.constant 0 : i32
    %8 = arith.cmpi ne, %7, %c0_i32_7 : i32
    scf.if %8 {
      %c0_8 = arith.constant 0 : index
      %c0_9 = arith.constant 0 : index
      %c0_10 = arith.constant 0 : index
      %9 = vector.load %arg7[%c0_8, %c0_9, %c0_10] : memref<2x8x128xf32, #tpu.memory_space<vmem>>, vector<2x8x128xf32>
      %10 = arith.addf %9, %2 : vector<2x8x128xf32>
      %c0_11 = arith.constant 0 : index
      %c0_12 = arith.constant 0 : index
      %c0_13 = arith.constant 0 : index
      %11 = vector.load %arg7[%c0_11, %c0_12, %c0_13] : memref<2x8x128xf32, #tpu.memory_space<vmem>>, vector<2x8x128xf32>
      tpu.vector_store %arg7[%c0_11, %c0_12, %c0_13], %10 {strides = array<i32>} : memref<2x8x128xf32, #tpu.memory_space<vmem>>, vector<2x8x128xf32>,
    } else {
    }
    return
  }
  func.func @transform_0(%arg0: i32, %arg1: i32, %arg2: i32, %arg3: i32) -> (i32, i32, i32) {
    %c0_i32 = arith.constant 0 : i32
    return %arg0, %arg2, %arg3 : i32, i32, i32
  }
  func.func @transform_1(%arg0: i32, %arg1: i32, %arg2: i32, %arg3: i32) -> (i32, i32, i32) {
    %c0_i32 = arith.constant 0 : i32
    return %arg0, %arg3, %arg1 : i32, i32, i32
  }
  func.func @transform_2(%arg0: i32, %arg1: i32, %arg2: i32, %arg3: i32) -> (i32, i32, i32) {
    %c0_i32 = arith.constant 0 : i32
    %c0_i32_0 = arith.constant 0 : i32
    return %arg0, %c0_i32, %arg1 : i32, i32, i32
  }
  func.func @transform_3(%arg0: i32, %arg1: i32, %arg2: i32, %arg3: i32) -> (i32, i32, i32) {
    %c0_i32 = arith.constant 0 : i32
    return %arg0, %arg2, %arg1 : i32, i32, i32
  }
}

</mosaic_0001>

<bundles_post_ra>
// kernel: forward.1
= control target key start
LH: loop header
LB: loop body
LE: loop exit
PB: predicated region body
PF: predicated region fallthrough
CT: control target
= control target key end

     0   :  { %8 = vsyncpa [#allocation3], 0  ;;  %s1212_s0 = inlined_call_operand.hbm [shape: f32[4,8,32], index: 0, kind: input, shape index: {}]   ;;  %s1213_s1 = inlined_call_operand.hbm [shape: f32[4,32,128], index: 1, kind: input, shape index: {}]   ;;  %s1214_s2 = inlined_call_operand.vmem [shape: f32[4,1,128], index: 2, kind: input, shape index: {}]   ;;  %s1215_s3 = inlined_call_operand.hbm [shape: f32[4,8,128], index: 3, kind: output, shape index: {}]  }
   0x1   :  { %10 = vsyncpa [#allocation3 + $0x1], 0 }
   0x2   :  { %11 = vsyncpa [#allocation6], 0 }
   0x3   :  { %13 = vsyncpa [#allocation6 + $0x1], 0 }
   0x4   :  { %14 = vsyncpa [#allocation4], 0 }
   0x5   :  { %16 = vsyncpa [#allocation4 + $0x1], 0  ;;  %s969_s12 = smov 0   ;;  %s971_s13 = smov 0  }
   0x6   :  { %s973_s14 = smov 0   ;;  %s975_s15 = smov 0  }
   0x7   :  { %s977_s16 = smov 0   ;;  %s979_s17 = smov 0  }
   0x8 LB: > { %s644_s18 = sadd.s32 4294967295, %s937_s17   ;;  %s645_s19 = sadd.s32 4294967294, %s937_s17   ;;  %s937_s17 = sphi %s979_s17, %s22_s17   ;;  %s933_s16 = sphi %s977_s16, %s1233_s16   ;;  %s929_s15 = sphi %s975_s15, %s1232_s15   ;;  %s925_s14 = sphi %s973_s14, %s1231_s14   ;;  %s921_s13 = sphi %s971_s13, %s1230_s13   ;;  %s917_s12 = sphi %s969_s12, %s1229_s12  }
   0x9   : > { %s48_s20 = sadd.s32 1, %s933_s16  ;;  %s59_s21 = sadd.s32 1, %s925_s14 }
   0xa   : > { %p50_p0 = scmp.ge.s32.totalorder %s48_s20, 2  ;;  %p66_p1 = scmp.ne.s32.totalorder %s925_s14, %s921_s13 }
   0xb   : > { %p67_p2 = scmp.eq.s32.totalorder %s937_s17, 0  ;;  %p72_p3 = scmp.ne.s32.totalorder %s921_s13, %s917_s12 }
   0xc   : > { %s1235_s20 = smov (%p50_p0, %s48_s20), 0  ;;  %p73_p5 = scmp.eq.s32.totalorder %s644_s18, 0 }
   0xd   : > { %p1010_p4 = por %p67_p2, %p66_p1  ;;  %s52_s23 = ssub.s32 %s933_s16, %s1235_s20 }
   0xe   : > { %p158_p6 = scmp.eq.s32.totalorder %s644_s18, 1  ;;  %p57_p7 = scmp.eq.s32.totalorder %s52_s23, 0 }
   0xf   : > { %p1016_p8 = por %p73_p5, %p72_p3  ;;  %p164_p10 = scmp.eq.s32.totalorder %s645_s19, 1 }
  0x10   : > { %p1020_p9 = por %p158_p6, %p66_p1  ;;  %p734_p13 = scmp.lt.s32.totalorder %s937_s17, 2 }
  0x11   : > { %s1219_s24 = scalar_select %p1016_p8, 1, 0 }
  0x12   : > { %s1220_s25 = scalar_select %p1020_p9, 1, 0 }
  0x13   : > { %s1025_s26 = scalar_select %p57_p7, %s925_s14, %s59_s21  }
  0x14   : > { %p1027_p11 = por %p164_p10, %p72_p3  ;;  %s1034_s28 = sand.u32 1, %s925_s14  }
  0x15   : > { %s648_s29 = sshll.u32 %s1034_s28, 4  ;;  %s669_s30 = sshll.u32 %s933_s16, 8 }
  0x16   : > { %s1221_s27 = scalar_select %p1027_p11, 1, 0 }
  0x17   : > { %s1041_s6 = scalar_lea.hbm %s1212_s0, %s669_s30  ;;  %s188_s7 = scalar_lea.vmem [#allocation2], %s648_s29 }
  0x18   : > { %s197_s8 = sshll.u32 %s188_s7, 4  ;;  %p1047_p0 = pnand %p734_p13, %p1010_p4  ;;  %s1043_s8 = int_to_ptr.vmem [resolvable:$true] %s197_s8 }
  0x19   : > { %s185_s10 = scalar_lea.sflag [#allocation3], %s1034_s28  ;;  %s791_s11 = scalar_lea.hbm %s1041_s6, 256 }
  0x1a   : > { %p792_p2 = scmp.ne.s32.totalorder %s1041_s6, %s791_s11  ;;  %p793_p3 = pneg %p1047_p0 }
  0x1b   : > { %s796_s21 = scalar_lea.hbm %s1212_s0, 512  ;;  %p797_p4 = scmp.lt.u32.totalorder %s1041_s6, %s1212_s0 }
  0x1c   : > { %p794_p5 = pnand %p793_p3, %p792_p2  ;;  %p798_p7 = scmp.lt.u32.totalorder %s796_s21, %s791_s11 }
  0x1d   : > { %p800_p13 = scmp.lt.u32.totalorder %s791_s11, %s1041_s6 }
  0x1e   : > { %p795_p6 = pneg %p794_p5  ;;  %p799_p10 = por %p798_p7, %p797_p4 }
  0x20   : > { %p801_p12 = por %p800_p13, %p799_p10 }
  0x22   : > { %p802_p1 = pnand %p801_p12, %p795_p6 }
  0x24   : > { %805 = shalt.err (!%p802_p1)
}
  0x25   : > { %s806_s29 = scalar_lea.vmem %s1043_s8, 256  ;;  %s939_s30 = smov [#allocation2]  }
  0x26   : > { %p807_p2 = scmp.ne.s32.totalorder %s1043_s8, %s806_s29  ;;  %s811_s4 = sshll.u32 %s939_s30, 4  ;;  %s812_s4 = int_to_ptr.vmem [resolvable:$false] %s811_s4 }
  0x27   : > { %s813_s5 = scalar_lea.vmem %s812_s4, 512  ;;  %p814_p9 = scmp.lt.s32.totalorder %s1043_s8, %s812_s4 }
  0x28   : > { %p809_p5 = pnand %p807_p2, %p793_p3  ;;  %p815_p4 = scmp.lt.s32.totalorder %s813_s5, %s806_s29 }
  0x2a   : > { %p810_p11 = pneg %p809_p5  ;;  %p816_p7 = por %p815_p4, %p814_p9 }
  0x2c   : > { %p817_p10 = pnand %p816_p7, %p810_p11 }
  0x2e   : > { %820 = shalt.err (!%p817_p10)
}
  0x2f   : > { %s940_s7 = smov 128   ;;  %s941_s11 = smov 8  }
  0x30   : > { %726 = dma.hbm_to_vmem [thread:$0]  (!%p1047_p0), %s1041_s6, 256, %s1043_s8, %s185_s10, %s940_s7, %s940_s7, %s941_s11  }
  0x31   : > { %p241_p9 = scmp.lt.s32.totalorder %s937_s17, 3  ;;  %s651_s18 = sshll.u32 %s1034_s28, 6 }
  0x32   : > { %s671_s19 = sshll.u32 %s933_s16, 10  ;;  %p1223_p11 = scmp.ge.s32.totalorder %s937_s17, 1 }
  0x33   : > { %s1095_s29 = scalar_lea.hbm %s1213_s1, %s671_s19  ;;  %s211_s30 = scalar_lea.vmem [#allocation5], %s651_s18 }
  0x34   : > { %p1088_p12 = pnand %p1223_p11, %p241_p9  ;;  %s222_s4 = sshll.u32 %s211_s30, 4  ;;  %s1097_s4 = int_to_ptr.vmem [resolvable:$true] %s222_s4 }
  0x35   : > { %s208_s6 = scalar_lea.sflag [#allocation6], %s1034_s28  ;;  %s821_s8 = scalar_lea.hbm %s1095_s29, 1024 }
  0x36   : > { %p822_p1 = scmp.ne.s32.totalorder %s1095_s29, %s821_s8  ;;  %s826_s19 = scalar_lea.hbm %s1213_s1, 2048 }
  0x37   : > { %p827_p2 = scmp.lt.u32.totalorder %s1095_s29, %s1213_s1  ;;  %p828_p5 = scmp.lt.u32.totalorder %s826_s19, %s821_s8 }
  0x38   : > { %p824_p6 = pnand %p822_p1, %p793_p3  ;;  %p830_p7 = scmp.lt.u32.totalorder %s821_s8, %s1095_s29 }
  0x39   : > { %p829_p4 = por %p828_p5, %p827_p2 }
  0x3a   : > { %p825_p13 = pneg %p824_p6 }
  0x3b   : > { %p831_p10 = por %p830_p7, %p829_p4 }
  0x3d   : > { %p832_p9 = pnand %p831_p10, %p825_p13 }
  0x3f   : > { %835 = shalt.err (!%p832_p9)
}
  0x40   : > { %s836_s18 = scalar_lea.vmem %s1097_s4, 1024  ;;  %s942_s30 = smov [#allocation5]  }
  0x41   : > { %p837_p11 = scmp.ne.s32.totalorder %s1097_s4, %s836_s18  ;;  %s841_s10 = sshll.u32 %s942_s30, 4  ;;  %s842_s10 = int_to_ptr.vmem [resolvable:$false] %s841_s10 }
  0x42   : > { %s843_s5 = scalar_lea.vmem %s842_s10, 2048  ;;  %p844_p8 = scmp.lt.s32.totalorder %s1097_s4, %s842_s10 }
  0x43   : > { %p839_p1 = pnand %p837_p11, %p793_p3  ;;  %p845_p2 = scmp.lt.s32.totalorder %s843_s5, %s836_s18 }
  0x45   : > { %p840_p6 = pneg %p839_p1  ;;  %p846_p5 = por %p845_p2, %p844_p8 }
  0x47   : > { %p847_p4 = pnand %p846_p5, %p840_p6 }
  0x49   : > { %850 = shalt.err (!%p847_p4)
}
  0x4a   : > { %729 = dma.hbm_to_vmem [thread:$0]  (!%p1047_p0), %s1095_s29, 1024, %s1097_s4, %s208_s6, %s940_s7, %s940_s7, %s941_s11  }
  0x4b   : > { %245 = sbr.rel (%p1088_p12) target bundleno = 326 (0x146), region = 32  ;;  %s1131_s8 = sand.u32 (!%p1088_p12), 1, %s921_s13  }
  0x4c   : > { %s656_s19 = sshll.u32 (!%p1088_p12), %s1131_s8, 4  ;;  %s248_s9 = scalar_lea.sflag (!%p1088_p12), [#allocation3], %s1131_s8 }
  0x4d   : > { %s1137_s22 = scalar_lea.vmem (!%p1088_p12), [#allocation2], %s656_s19  ;;  %p1225_p8 = scmp.ne.s32.totalorder (!%p1088_p12), %s1219_s24, 0 }
  0x52   : > { %904 = dma.done.wait (%p1225_p8), %s248_s9, 256  }
  0x53   : > { %906 = vsyncadd (%p1225_p8), %s248_s9, 4294967040  ;;  %s657_s28 = sshll.u32 %s1131_s8, 6  ;;  %s257_s7 = scalar_lea.sflag [#allocation6], %s1131_s8 }
  0x54   : > { %s260_s11 = scalar_lea.vmem [#allocation5], %s657_s28 }
  0x55   : > { %908 = dma.done.wait (%p1225_p8), %s257_s7, 1024  }
  0x56   : > { %910 = vsyncadd (%p1225_p8), %s257_s7, 4294966272  ;;  %v943_v0 = vmov 0.0|0.0   ;;  %vm944_vm0 = vmmov 0   ;;  %v945_v1 = vmov 0.0   ;;  %v309_v2 = vld [vmem:[%s260_s11] sm:$0xff]  ;;  %v310_v3 = vld [vmem:[%s260_s11 + $0x8] sm:$0xff] }
  0x57   : > { %705 = vmatprep.subr.bf16.mxu0 %v943_v0  ;;  %711 = vmatprep.subr.bf16.mxu1 %v943_v0  ;;  %v313_v4 = vld [vmem:[%s260_s11 + $0x20] sm:$0xff]  ;;  %v706_v5 = vpack.c.bf16 %v310_v3, %v309_v2  ;;  %v314_v6 = vld [vmem:[%s260_s11 + $0x28] sm:$0xff]  ;;  %v311_v7 = vld [vmem:[%s260_s11 + $0x10] sm:$0xff]  ;;  %vm317_vm1 = vcmask 261120   ;;  %s659_s24 = sshll.u32 %s929_s15, 1  ;;  %s294_s6 = scalar_lea.vmem [#allocation7], %s656_s19 }
  0x58   : > { %691 = vmatprep.mubr.msk.f32.mxu0 %vm944_vm0, %v945_v1  ;;  %702 = vmatprep.mubr.msk.f32.mxu1 %vm944_vm0, %v945_v1  ;;  %v312_v8 = vld [vmem:[%s260_s11 + $0x18] sm:$0xff]  ;;  %v712_v9 = vpack.c.bf16 %v314_v6, %v313_v4  ;;  %v315_v10 = vld [vmem:[%s260_s11 + $0x30] sm:$0xff]  ;;  %p299_p0 = scmp.lt.s32.totalorder %s659_s24, 3  ;;  %s512_s23 = sshll.u32 %s294_s6, 4  ;;  %s1158_s23 = int_to_ptr.vmem [resolvable:$true] %s512_s23 }
  0x59   : > { %v316_v11 = vld [vmem:[%s260_s11 + $0x38] sm:$0xff]  ;;  %707 = vmatpush3.bf16.msra.mxu0 %v706_v5  ;;  %v709_v12 = vpack.c.bf16 %v312_v8, %v311_v7  ;;  %v307_v14 = vld [vmem:[%s1137_s22] sm:$0xff]  ;;  %s672_s18 = sshll.u32 %s929_s15, 8  ;;  %s497_s15 = scalar_lea.sflag [#allocation4], %s1131_s8 }
  0x5a   : > { %713 = vmatpush3.bf16.msra.mxu1 %v712_v9  ;;  %708 = vmatprep.subr.bf16.mxu0 %v943_v0  ;;  %v715_v13 = vpack.c.bf16 %v316_v11, %v315_v10  ;;  %v308_v15 = vld [vmem:[%s1137_s22 + $0x8] sm:$0xff]  ;;  %s1237_s24 = smov (!%p299_p0, %s659_s24), 3  ;;  %s1163_s5 = scalar_lea.hbm %s1215_s3, %s672_s18 }
  0x5b   : > { %714 = vmatprep.subr.bf16.mxu1 %v943_v0  ;;  %s304_s4 = scalar_lea.vmem %s1214_s2, %s1237_s24  ;;  %s851_s19 = scalar_lea.vmem %s1158_s23, 256 }
  0x5c   : > { %v662_v16 = vld [vmem:[%s304_s4] ss:$0 sm:$0xff]  ;;  %v663_v17 = vld [vmem:[%s304_s4 + $0x1] ss:$0 sm:$0xff]  ;;  %p852_p3 = scmp.ne.s32.totalorder %s1158_s23, %s851_s19  ;;  %p1226_p12 = scmp.ne.s32.totalorder %s1220_s25, 0 }
  0x5d   : > { %710 = vmatpush3.bf16.msra.mxu0 %v709_v12  ;;  %s946_s9 = smov [#allocation7]  }
  0x5e   : > { %716 = vmatpush3.bf16.msra.mxu1 %v715_v13  ;;  %p853_p13 = pnand %p852_p3, %p1226_p12  ;;  %s855_s22 = sshll.u32 %s946_s9, 4  ;;  %s856_s22 = int_to_ptr.vmem [resolvable:$false] %s855_s22 }
  0x5f   : > { %s857_s28 = scalar_lea.vmem %s856_s22, 512  ;;  %p858_p10 = scmp.lt.s32.totalorder %s1158_s23, %s856_s22 }
  0x60   : > { %692 = vmatmul.mubr.msk.f32.vlgmr.msra.gmra.mrb[0].mxu0 %vm317_vm1, %v307_v14  ;;  %p854_p7 = pneg %p853_p13  ;;  %p859_p9 = scmp.lt.s32.totalorder %s857_s28, %s851_s19 }
  0x61   : > { %703 = vmatmul.mubr.msk.f32.vlgmr.msra.gmra.mrb[0].mxu1 %vm317_vm1, %v308_v15 }
  0x62   : > { %p860_p11 = por %p859_p9, %p858_p10 }
  0x64   : > { %p861_p1 = pnand %p860_p11, %p854_p7 }
 0x133   : > { %v387_v18 = vpop.f32.mrb[0].mxu0 }
 0x134   : > { %v482_v19 = vadd.f32 %v662_v16, %v387_v18  ;;  %v460_v20 = vpop.f32.mrb[0].mxu1  ;;  %v693_v21 = vpop.f32.mrb[1].mxu0 }
 0x135   : > { %v483_v22 = vadd.f32 %v663_v17, %v460_v20  ;;  %v704_v23 = vpop.f32.mrb[1].mxu1 }
 0x136   : > { %484 = vst [vmem:[%s294_s6] sm:$0xff] %v482_v19 }
 0x137   : > { %485 = vst [vmem:[%s294_s6 + $0x8] sm:$0xff] %v483_v22 }
 0x138   : > { %864 = shalt.err (!%p861_p1)
}
 0x139   : > { %s865_s7 = scalar_lea.hbm %s1163_s5, 256  ;;  %s869_s21 = scalar_lea.hbm %s1215_s3, 512 }
 0x13a   : > { %p866_p6 = scmp.ne.s32.totalorder %s1163_s5, %s865_s7  ;;  %p870_p4 = scmp.lt.u32.totalorder %s1163_s5, %s1215_s3 }
 0x13b   : > { %p871_p8 = scmp.lt.u32.totalorder %s869_s21, %s865_s7  ;;  %p873_p3 = scmp.lt.u32.totalorder %s865_s7, %s1163_s5 }
 0x13c   : > { %p867_p2 = pnand %p866_p6, %p1226_p12 }
 0x13d   : > { %p872_p0 = por %p871_p8, %p870_p4 }
 0x13e   : > { %p868_p5 = pneg %p867_p2 }
 0x13f   : > { %p874_p13 = por %p873_p3, %p872_p0 }
 0x141   : > { %p875_p7 = pnand %p874_p13, %p868_p5 }
 0x143   : > { %878 = shalt.err (!%p875_p7)
}
 0x144   : > { %s947_s6 = smov 128   ;;  %s948_s18 = smov 8  }
 0x145   : > { %721 = dma.vmem_to_hbm [thread:$0]  (%p1226_p12), %s1158_s23, 256, %s1163_s5, %s497_s15, %s947_s6, %s947_s6, %s948_s18  }
 0x146 PF: > { %s527_s30 = sand.u32 1, %s917_s12   ;;  %p1227_p10 = scmp.ne.s32.totalorder %s1221_s27, 0 }
 0x147   : > { %p1228_p9 = scmp.ge.s32.totalorder %s937_s17, 2  ;;  %s528_s10 = scalar_lea.sflag [#allocation4], %s527_s30 }
 0x149   : > { %p731_p11 = pnand %p1228_p9, %p1227_p10 }
 0x14b   : > { %912 = dma.done.wait (!%p731_p11), %s528_s10, 256  }
 0x14c   : > { %914 = vsyncadd (!%p731_p11), %s528_s10, 4294967040  ;;  %s22_s17 = sadd.s32 1, %s937_s17   ;;  %s1229_s12 = smov %s921_s13 }
 0x14d   : > { %p19_p1 = scmp.ge.s32.totalorder %s22_s17, 4   ;;  %s1230_s13 = smov %s925_s14 }
 0x14e   : > { %s1231_s14 = smov %s1025_s26  ;;  %s1232_s15 = smov %s933_s16 }
 0x14f   : > { %s1233_s16 = smov %s1235_s20  ;;  %21 = sbr.rel (!%p19_p1) target bundleno = 8 (0x8), region = 101 }
 0x156   :  { %533 = vsyncpa [#allocation3], 1 }
 0x157   :  { %535 = vsyncpa [#allocation3 + $0x1], 1 }
 0x158   :  { %536 = vsyncpa [#allocation6], 1 }
 0x159   :  { %538 = vsyncpa [#allocation6 + $0x1], 1 }
 0x15a   :  { %539 = vsyncpa [#allocation4], 1 }
 0x15b   :  { %541 = vsyncpa [#allocation4 + $0x1], 1 }

</bundles_post_ra>
